<compile_context>
chip_gen: v5e
topology: v5e:2x2
jax: 0.10.0
libtpu: 0.0.40
codegen_flags: <defaults>
</compile_context>

<pallas_src>
import functools

import jax
import jax.numpy as jnp
from jax.experimental import pallas as pl
from jax.experimental.pallas import tpu as pltpu


def _round_up(x, m):
    return ((x + m - 1) // m) * m


def _make_kernel(fuse_fc):
    """Build the kernel body.  Outputs: (pi_ref, vf_ref) -- two lane-aligned stores."""

    def _heads(h0, w1_ref, b1_ref, wv2_ref, bv2_ref, wp2_ref, bp2_ref, pi_ref, vf_ref):
        vf_dim = wv2_ref.shape[0]
        # Stage 1: shared-input linear for both heads (vf columns first, then pi),
        # f32 accumulate + f32 tanh, then back to the compute dtype for stage 2.
        h = jnp.tanh(
            jnp.dot(h0, w1_ref[...], preferred_element_type=jnp.float32) + b1_ref[...]
        ).astype(w1_ref.dtype)
        # Stage 2: two small head matmuls; the split at column vf_dim (=256) is
        # 128-lane aligned thanks to the vf-first layout.
        vf = jnp.tanh(
            jnp.dot(h[:, :vf_dim], wv2_ref[...], preferred_element_type=jnp.float32)
            + bv2_ref[...]
        )
        pi = jnp.tanh(
            jnp.dot(h[:, vf_dim:], wp2_ref[...], preferred_element_type=jnp.float32)
            + bp2_ref[...]
        )
        pi_ref[...] = pi.astype(pi_ref.dtype)
        vf_ref[...] = vf.astype(vf_ref.dtype)

    if fuse_fc:
        # fc has been folded into the head-1 weights in the wrapper.
        def kernel(x_ref, w1_ref, b1_ref, wv2_ref, bv2_ref, wp2_ref, bp2_ref,
                   pi_ref, vf_ref):
            _heads(x_ref[...], w1_ref, b1_ref, wv2_ref, bv2_ref, wp2_ref, bp2_ref,
                   pi_ref, vf_ref)
    else:
        # Explicit fc matmul (no nonlinearity after fc in the original module).
        def kernel(x_ref, wfc_ref, bfc_ref, w1_ref, b1_ref, wv2_ref, bv2_ref,
                   wp2_ref, bp2_ref, pi_ref, vf_ref):
            h0 = (
                jnp.dot(x_ref[...], wfc_ref[...], preferred_element_type=jnp.float32)
                + bfc_ref[...]
            ).astype(wfc_ref.dtype)
            _heads(h0, w1_ref, b1_ref, wv2_ref, bv2_ref, wp2_ref, bp2_ref,
                   pi_ref, vf_ref)

    return kernel


def _pack_params(params, compute_dtype, fuse_fc):
    """Build kernel weights.  Head-1 layout is [vf | pi] (wide head first).

    Returns (wfc, bfc, w1, b1, wv2, bv2, wp2, bp2); wfc/bfc are None when fuse_fc.
    Weights are cast to `compute_dtype`; biases stay float32 (added post-matmul).
    """
    w_fc, b_fc = params["w_fc"], params["b_fc"]
    w_p1, b_p1 = params["w_p1"], params["b_p1"]
    w_v1, b_v1 = params["w_v1"], params["b_v1"]
    w_p2, b_p2 = params["w_p2"], params["b_p2"]
    w_v2, b_v2 = params["w_v2"], params["b_v2"]

    if fuse_fc:
        # fc has no nonlinearity: x @ (Wfc @ Wh1) == (x @ Wfc) @ Wh1  (exact up to
        # f32 re-association; the fold itself is done once in f32 outside the kernel).
        w1 = jnp.concatenate([w_fc @ w_v1, w_fc @ w_p1], axis=1)                  # [F, n1]
        b1 = jnp.concatenate([b_fc @ w_v1 + b_v1, b_fc @ w_p1 + b_p1], axis=1)    # [1, n1]
        wfc, bfc = None, None
    else:
        w1 = jnp.concatenate([w_v1, w_p1], axis=1)                                # [S, n1]
        b1 = jnp.concatenate([b_v1, b_p1], axis=1)                                # [1, n1]
        wfc = w_fc.astype(compute_dtype)
        bfc = b_fc.astype(jnp.float32)

    w1 = w1.astype(compute_dtype)
    b1 = b1.astype(jnp.float32)
    wv2 = w_v2.astype(compute_dtype)
    bv2 = b_v2.astype(jnp.float32)
    wp2 = w_p2.astype(compute_dtype)
    bp2 = b_p2.astype(jnp.float32)
    return wfc, bfc, w1, b1, wv2, bv2, wp2, bp2


@functools.partial(jax.jit, static_argnames=("block_b", "compute_dtype", "fuse_fc"))
def custom_network_shared_forward(features, params, *, block_b=1024,
                                  compute_dtype=jnp.bfloat16, fuse_fc=None):
    """features: [B, feature_dim] f32 -> (latent_pi [B, pi_dim], latent_vf [B, vf_dim]) f32."""
    B, F = features.shape
    shared_dim = params["w_fc"].shape[1]
    pi_dim = params["w_p2"].shape[1]
    vf_dim = params["w_v2"].shape[1]
    n1 = vf_dim + pi_dim

    # Gate the fc-into-head-1 fusion on feature_dim: fuse only while it reduces both
    # FLOPs and weight bytes (F*n1 <= F*shared + shared*n1).
    if fuse_fc is None:
        fuse_fc = (n1 <= shared_dim) or (F * (n1 - shared_dim) <= shared_dim * n1)

    wfc, bfc, w1, b1, wv2, bv2, wp2, bp2 = _pack_params(params, compute_dtype, fuse_fc)

    # ---- batch tiling -------------------------------------------------------
    block_b = max(8, (int(block_b) // 8) * 8)          # clamp to a sublane multiple
    b8 = _round_up(B, 8)
    bb = min(block_b, b8)
    # Keep >=2 grid steps when the padded batch allows it, so the "parallel" batch
    # axis shards across both TensorCores on v7x (harmless on v5e/v6e).
    if b8 // bb < 2 and b8 >= 16 and b8 % 16 == 0:
        bb = b8 // 2
    b_pad = _round_up(B, bb)

    x = features.astype(compute_dtype)
    if b_pad != B:
        x = jnp.pad(x, ((0, b_pad - B), (0, 0)))
    grid = (b_pad // bb,)

    # ---- cost estimate (advisory) ------------------------------------------
    w_bytes = jnp.dtype(compute_dtype).itemsize
    k1 = F if fuse_fc else shared_dim
    flops = 2 * b_pad * (k1 * n1 + vf_dim * vf_dim + pi_dim * pi_dim)
    weight_elems = k1 * n1 + vf_dim * vf_dim + pi_dim * pi_dim
    bias_elems = n1 + vf_dim + pi_dim
    if not fuse_fc:
        flops += 2 * b_pad * F * shared_dim
        weight_elems += F * shared_dim
        bias_elems += shared_dim
    cost = pl.CostEstimate(
        flops=flops,
        transcendentals=b_pad * (n1 + vf_dim + pi_dim),
        bytes_accessed=(b_pad * F * w_bytes + weight_elems * w_bytes
                        + bias_elems * 4 + b_pad * (vf_dim + pi_dim) * 4),
    )

    # ---- specs --------------------------------------------------------------
    def _const_spec(arr):
        # Weights/biases: same block every grid step -> stay VMEM-resident.
        return pl.BlockSpec(arr.shape, lambda i: (0, 0))

    args = [x]
    in_specs = [pl.BlockSpec((bb, F), lambda i: (i, 0))]   # batch-tiled activations
    if not fuse_fc:
        args += [wfc, bfc]
        in_specs += [_const_spec(wfc), _const_spec(bfc)]
    args += [w1, b1, wv2, bv2, wp2, bp2]
    in_specs += [_const_spec(a) for a in (w1, b1, wv2, bv2, wp2, bp2)]

    out_shape = (
        jax.ShapeDtypeStruct((b_pad, pi_dim), jnp.float32),
        jax.ShapeDtypeStruct((b_pad, vf_dim), jnp.float32),
    )
    out_specs = (
        pl.BlockSpec((bb, pi_dim), lambda i: (i, 0)),   # 64-wide (full array dim)
        pl.BlockSpec((bb, vf_dim), lambda i: (i, 0)),   # 256-wide, lane-dense store
    )

    latent_pi, latent_vf = pl.pallas_call(
        _make_kernel(fuse_fc),
        out_shape=out_shape,
        grid=grid,
        in_specs=in_specs,
        out_specs=out_specs,
        compiler_params=pltpu.CompilerParams(
            dimension_semantics=("parallel",),          # megacore sharding on v7x
        ),
        cost_estimate=cost,
    )(*args)

    if b_pad != B:
        latent_pi = latent_pi[:B]
        latent_vf = latent_vf[:B]
    return latent_pi, latent_vf


def init_params(key, feature_dim, shared_dim=256, pi_dim=64, vf_dim=256):
    """Deterministic synthetic init (PyTorch-Linear-style uniform ranges)."""
    def linear(k, fan_in, fan_out):
        kw, kb = jax.random.split(k)
        bound = 1.0 / jnp.sqrt(fan_in)
        w = jax.random.uniform(kw, (fan_in, fan_out), jnp.float32, -bound, bound)
        b = jax.random.uniform(kb, (1, fan_out), jnp.float32, -bound, bound)
        return w, b

    keys = jax.random.split(key, 5)
    w_fc, b_fc = linear(keys[0], feature_dim, shared_dim)
    w_p1, b_p1 = linear(keys[1], shared_dim, pi_dim)
    w_p2, b_p2 = linear(keys[2], pi_dim, pi_dim)
    w_v1, b_v1 = linear(keys[3], shared_dim, vf_dim)
    w_v2, b_v2 = linear(keys[4], vf_dim, vf_dim)
    return {
        "w_fc": w_fc, "b_fc": b_fc,
        "w_p1": w_p1, "b_p1": b_p1,
        "w_p2": w_p2, "b_p2": b_p2,
        "w_v1": w_v1, "b_v1": b_v1,
        "w_v2": w_v2, "b_v2": b_v2,
    }


def reference_forward(features, p):
    """Pure-JAX reference matching the PyTorch module exactly (unfused, f32)."""
    h = features @ p["w_fc"] + p["b_fc"]
    pi = jnp.tanh(jnp.tanh(h @ p["w_p1"] + p["b_p1"]) @ p["w_p2"] + p["b_p2"])
    vf = jnp.tanh(jnp.tanh(h @ p["w_v1"] + p["b_v1"]) @ p["w_v2"] + p["b_v2"])
    return pi, vf


if __name__ == "__main__":
    key = jax.random.PRNGKey(0)
    k_x, k_p = jax.random.split(key)

    batch = 4
    feature_dim = 32

    features = jax.random.normal(k_x, (batch, feature_dim), jnp.float32)
    params = init_params(k_p, feature_dim)

    ref_pi, ref_vf = reference_forward(features, params)

    # Default path: bf16 compute (f32 accumulate / f32 tanh / f32 outputs).
    latent_pi, latent_vf = custom_network_shared_forward(features, params)
    jax.block_until_ready((latent_pi, latent_vf))
    assert latent_pi.shape == (batch, 64) and latent_vf.shape == (batch, 256)
    assert latent_pi.dtype == jnp.float32 and latent_vf.dtype == jnp.float32
    assert jnp.allclose(latent_pi, ref_pi, atol=3e-2, rtol=3e-2)
    assert jnp.allclose(latent_vf, ref_vf, atol=3e-2, rtol=3e-2)

    # f32 compute path (fused fc): exact up to f32 re-association.
    pi32, vf32 = custom_network_shared_forward(
        features, params, compute_dtype=jnp.float32)
    jax.block_until_ready((pi32, vf32))
    assert jnp.allclose(pi32, ref_pi, atol=1e-4, rtol=1e-4)
    assert jnp.allclose(vf32, ref_vf, atol=1e-4, rtol=1e-4)

    # f32 compute, unfused-fc fallback (the large-feature_dim path) also compiles/runs.
    pi_u, vf_u = custom_network_shared_forward(
        features, params, compute_dtype=jnp.float32, fuse_fc=False)
    jax.block_until_ready((pi_u, vf_u))
    assert jnp.allclose(pi_u, ref_pi, atol=1e-4, rtol=1e-4)
    assert jnp.allclose(vf_u, ref_vf, atol=1e-4, rtol=1e-4)

    print("KERNEL_OK")
</pallas_src>

<mosaic_0001>
module attributes {stable_mosaic.version = 11 : i64} {
  func.func @kernel(%arg0: i32, %arg1: memref<8x32xbf16, #tpu.memory_space<vmem>>, %arg2: memref<32x320xbf16, #tpu.memory_space<vmem>>, %arg3: memref<1x320xf32, #tpu.memory_space<vmem>>, %arg4: memref<256x256xbf16, #tpu.memory_space<vmem>>, %arg5: memref<1x256xf32, #tpu.memory_space<vmem>>, %arg6: memref<64x64xbf16, #tpu.memory_space<vmem>>, %arg7: memref<1x64xf32, #tpu.memory_space<vmem>>, %arg8: memref<8x64xf32, #tpu.memory_space<vmem>>, %arg9: memref<8x256xf32, #tpu.memory_space<vmem>>) attributes {dimension_semantics = [#tpu.dimension_semantics<parallel>], iteration_bounds = array<i64: 1>, scalar_prefetch = 0 : i64, scratch_operands = 0 : i64, tpu.core_type = #tpu.core_type<tc>, window_params = [{transform_indices = @transform_0, window_bounds = array<i64: 8, 32>}, {pipeline_mode = #tpu.pipeline_mode<synchronous>, transform_indices = @transform_1, window_bounds = array<i64: 32, 320>}, {pipeline_mode = #tpu.pipeline_mode<synchronous>, transform_indices = @transform_2, window_bounds = array<i64: 1, 320>}, {pipeline_mode = #tpu.pipeline_mode<synchronous>, transform_indices = @transform_3, window_bounds = array<i64: 256, 256>}, {pipeline_mode = #tpu.pipeline_mode<synchronous>, transform_indices = @transform_4, window_bounds = array<i64: 1, 256>}, {pipeline_mode = #tpu.pipeline_mode<synchronous>, transform_indices = @transform_5, window_bounds = array<i64: 64, 64>}, {pipeline_mode = #tpu.pipeline_mode<synchronous>, transform_indices = @transform_6, window_bounds = array<i64: 1, 64>}, {transform_indices = @transform_7, window_bounds = array<i64: 8, 64>}, {transform_indices = @transform_8, window_bounds = array<i64: 8, 256>}]} {
    %c0 = arith.constant 0 : index
    %c0_0 = arith.constant 0 : index
    %0 = vector.load %arg1[%c0, %c0_0] : memref<8x32xbf16, #tpu.memory_space<vmem>>, vector<8x32xbf16>
    %c0_1 = arith.constant 0 : index
    %c0_2 = arith.constant 0 : index
    %1 = vector.load %arg2[%c0_1, %c0_2] : memref<32x320xbf16, #tpu.memory_space<vmem>>, vector<32x320xbf16>
    %cst = arith.constant dense<0.000000e+00> : vector<8x320xf32>
    %2 = tpu.matmul %0, %1, %cst {dimension_numbers = #tpu.dot_dimension_numbers<[1], [0], [0], [1], [0, 0, 1, 1], [], []>} : vector<8x32xbf16>, vector<32x320xbf16>, vector<8x320xf32> -> vector<8x320xf32>
    %c0_3 = arith.constant 0 : index
    %c0_4 = arith.constant 0 : index
    %3 = vector.load %arg3[%c0_3, %c0_4] : memref<1x320xf32, #tpu.memory_space<vmem>>, vector<1x320xf32>
    %4 = vector.broadcast %3 : vector<1x320xf32> to vector<8x320xf32>
    %5 = arith.addf %2, %4 : vector<8x320xf32>
    %6 = math.tanh %5 : vector<8x320xf32>
    %7 = arith.truncf %6 : vector<8x320xf32> to vector<8x320xbf16>
    %8 = vector.extract_strided_slice %7 {offsets = [0, 0], sizes = [8, 256], strides = [1, 1]} : vector<8x320xbf16> to vector<8x256xbf16>
    %c0_5 = arith.constant 0 : index
    %c0_6 = arith.constant 0 : index
    %9 = vector.load %arg4[%c0_5, %c0_6] : memref<256x256xbf16, #tpu.memory_space<vmem>>, vector<256x256xbf16>
    %cst_7 = arith.constant dense<0.000000e+00> : vector<8x256xf32>
    %10 = tpu.matmul %8, %9, %cst_7 {dimension_numbers = #tpu.dot_dimension_numbers<[1], [0], [0], [1], [0, 0, 1, 1], [], []>} : vector<8x256xbf16>, vector<256x256xbf16>, vector<8x256xf32> -> vector<8x256xf32>
    %c0_8 = arith.constant 0 : index
    %c0_9 = arith.constant 0 : index
    %11 = vector.load %arg5[%c0_8, %c0_9] : memref<1x256xf32, #tpu.memory_space<vmem>>, vector<1x256xf32>
    %12 = vector.broadcast %11 : vector<1x256xf32> to vector<8x256xf32>
    %13 = arith.addf %10, %12 : vector<8x256xf32>
    %14 = math.tanh %13 : vector<8x256xf32>
    %15 = vector.extract_strided_slice %7 {offsets = [0, 256], sizes = [8, 64], strides = [1, 1]} : vector<8x320xbf16> to vector<8x64xbf16>
    %c0_10 = arith.constant 0 : index
    %c0_11 = arith.constant 0 : index
    %16 = vector.load %arg6[%c0_10, %c0_11] : memref<64x64xbf16, #tpu.memory_space<vmem>>, vector<64x64xbf16>
    %cst_12 = arith.constant dense<0.000000e+00> : vector<8x64xf32>
    %17 = tpu.matmul %15, %16, %cst_12 {dimension_numbers = #tpu.dot_dimension_numbers<[1], [0], [0], [1], [0, 0, 1, 1], [], []>} : vector<8x64xbf16>, vector<64x64xbf16>, vector<8x64xf32> -> vector<8x64xf32>
    %c0_13 = arith.constant 0 : index
    %c0_14 = arith.constant 0 : index
    %18 = vector.load %arg7[%c0_13, %c0_14] : memref<1x64xf32, #tpu.memory_space<vmem>>, vector<1x64xf32>
    %19 = vector.broadcast %18 : vector<1x64xf32> to vector<8x64xf32>
    %20 = arith.addf %17, %19 : vector<8x64xf32>
    %21 = math.tanh %20 : vector<8x64xf32>
    %c0_15 = arith.constant 0 : index
    %c0_16 = arith.constant 0 : index
    %22 = vector.load %arg8[%c0_15, %c0_16] : memref<8x64xf32, #tpu.memory_space<vmem>>, vector<8x64xf32>
    tpu.vector_store %arg8[%c0_15, %c0_16], %21 {strides = array<i32>} : memref<8x64xf32, #tpu.memory_space<vmem>>, vector<8x64xf32>,
    %c0_17 = arith.constant 0 : index
    %c0_18 = arith.constant 0 : index
    %23 = vector.load %arg9[%c0_17, %c0_18] : memref<8x256xf32, #tpu.memory_space<vmem>>, vector<8x256xf32>
    tpu.vector_store %arg9[%c0_17, %c0_18], %14 {strides = array<i32>} : memref<8x256xf32, #tpu.memory_space<vmem>>, vector<8x256xf32>,
    return
  }
  func.func @transform_0(%arg0: i32) -> (i32, i32) {
    %c0_i32 = arith.constant 0 : i32
    %c0_i32_0 = arith.constant 0 : i32
    return %arg0, %c0_i32 : i32, i32
  }
  func.func @transform_1(%arg0: i32) -> (i32, i32) {
    %c0_i32 = arith.constant 0 : i32
    %c0_i32_0 = arith.constant 0 : i32
    %c0_i32_1 = arith.constant 0 : i32
    return %c0_i32, %c0_i32_0 : i32, i32
  }
  func.func @transform_2(%arg0: i32) -> (i32, i32) {
    %c0_i32 = arith.constant 0 : i32
    %c0_i32_0 = arith.constant 0 : i32
    %c0_i32_1 = arith.constant 0 : i32
    return %c0_i32, %c0_i32_0 : i32, i32
  }
  func.func @transform_3(%arg0: i32) -> (i32, i32) {
    %c0_i32 = arith.constant 0 : i32
    %c0_i32_0 = arith.constant 0 : i32
    %c0_i32_1 = arith.constant 0 : i32
    return %c0_i32, %c0_i32_0 : i32, i32
  }
  func.func @transform_4(%arg0: i32) -> (i32, i32) {
    %c0_i32 = arith.constant 0 : i32
    %c0_i32_0 = arith.constant 0 : i32
    %c0_i32_1 = arith.constant 0 : i32
    return %c0_i32, %c0_i32_0 : i32, i32
  }
  func.func @transform_5(%arg0: i32) -> (i32, i32) {
    %c0_i32 = arith.constant 0 : i32
    %c0_i32_0 = arith.constant 0 : i32
    %c0_i32_1 = arith.constant 0 : i32
    return %c0_i32, %c0_i32_0 : i32, i32
  }
  func.func @transform_6(%arg0: i32) -> (i32, i32) {
    %c0_i32 = arith.constant 0 : i32
    %c0_i32_0 = arith.constant 0 : i32
    %c0_i32_1 = arith.constant 0 : i32
    return %c0_i32, %c0_i32_0 : i32, i32
  }
  func.func @transform_7(%arg0: i32) -> (i32, i32) {
    %c0_i32 = arith.constant 0 : i32
    %c0_i32_0 = arith.constant 0 : i32
    return %arg0, %c0_i32 : i32, i32
  }
  func.func @transform_8(%arg0: i32) -> (i32, i32) {
    %c0_i32 = arith.constant 0 : i32
    %c0_i32_0 = arith.constant 0 : i32
    return %arg0, %c0_i32 : i32, i32
  }
}

</mosaic_0001>

<bundles_post_ra>
// kernel: custom_network_shared_forward.1
= control target key start
LH: loop header
LB: loop body
LE: loop exit
PB: predicated region body
PF: predicated region fallthrough
CT: control target
= control target key end

     0   :  { %vm78_vm0 = vcmask 261120   ;;  %vm421_vm1 = vcmask 523264   ;;  %s988_s1 = inlined_call_operand.vmem [shape: bf16[32,320], index: 1, kind: input, shape index: {}]   ;;  %s989_s3 = inlined_call_operand.vmem [shape: bf16[256,256], index: 3, kind: input, shape index: {}]   ;;  %s990_s0 = inlined_call_operand.vmem [shape: bf16[8,32], index: 0, kind: input, shape index: {}]   ;;  %s991_s5 = inlined_call_operand.vmem [shape: bf16[64,64], index: 5, kind: input, shape index: {}]   ;;  %s992_s2 = inlined_call_operand.vmem [shape: f32[1,320], index: 2, kind: input, shape index: {}]   ;;  %s993_s6 = inlined_call_operand.vmem [shape: f32[1,64], index: 6, kind: input, shape index: {}]   ;;  %s994_s4 = inlined_call_operand.vmem [shape: f32[1,256], index: 4, kind: input, shape index: {}]   ;;  %s995_s8 = inlined_call_operand.vmem [shape: f32[8,256], index: 8, kind: output, shape index: {1}]   ;;  %s996_s7 = inlined_call_operand.vmem [shape: f32[8,64], index: 7, kind: output, shape index: {0}]  }
   0x1   :  { %v464_v0 = vld [vmem:[%s988_s1 + $0x18] sm:$0xf]  ;;  %v626_v1 = vld [vmem:[%s988_s1 + $0x20] sm:$0xf0]  ;;  %v625_v2 = vld [vmem:[%s988_s1 + $0x1c] sm:$0xf] }
   0x2   :  { %v465_v3 = vor.u32 %v626_v1, %v464_v0  ;;  %v466_v4 = vld [vmem:[%s988_s1 + $0x24] sm:$0xf0]  ;;  %v452_v5 = vld [vmem:[%s988_s1] sm:$0xf]  ;;  %v623_v6 = vld [vmem:[%s988_s1 + $0x8] sm:$0xf0] }
   0x3   :  { %v469_v7 = vor.u32 %v625_v2, %v466_v4  ;;  %v622_v8 = vld [vmem:[%s988_s1 + $0x4] sm:$0xf]  ;;  %v454_v9 = vld [vmem:[%s988_s1 + $0xc] sm:$0xf0]  ;;  %v472_v10 = vld [vmem:[%s988_s1 + $0x20] sm:$0xf]  ;;  %v453_v11 = vor.u32 %v623_v6, %v452_v5 }
   0x4   :  { %88 = vmatpush.bf16.msra.mxu0 %v465_v3  ;;  %v627_v12 = vld [vmem:[%s988_s1 + $0x28] sm:$0xf0]  ;;  %v460_v13 = vld [vmem:[%s988_s1 + $0x8] sm:$0xf]  ;;  %v457_v14 = vor.u32 %v622_v8, %v454_v9  ;;  %v624_v16 = vld [vmem:[%s988_s1 + $0x10] sm:$0xf0] }
   0x5   :  { %101 = vmatpush.bf16.msra.mxu1 %v469_v7  ;;  %v473_v15 = vor.u32 %v627_v12, %v472_v10  ;;  %v535_v17 = vld [vmem:[%s989_s3 + $0x70] sm:$0xf]  ;;  %v643_v18 = vld [vmem:[%s989_s3 + $0x74] sm:$0xf0]  ;;  %v29_v19 = vld [vmem:[%s990_s0] sm:$0xf]  ;;  %v461_v24 = vor.u32 %v624_v16, %v460_v13 }
   0x6   :  { %v536_v20 = vor.u32 %v643_v18, %v535_v17  ;;  %v599_v21 = vld [vmem:[%s989_s3 + $0xf0] sm:$0xf]  ;;  %v659_v22 = vld [vmem:[%s989_s3 + $0xf4] sm:$0xf0]  ;;  %v642_v23 = vld [vmem:[%s989_s3 + $0x74] sm:$0xf] }
   0x7   :  { %114 = vmatpush.bf16.msra.mxu2 %v473_v15  ;;  %v600_v25 = vor.u32 %v659_v22, %v599_v21  ;;  %v537_v26 = vld [vmem:[%s989_s3 + $0x78] sm:$0xf0]  ;;  %v658_v27 = vld [vmem:[%s989_s3 + $0xf4] sm:$0xf]  ;;  %v527_v31 = vld [vmem:[%s989_s3 + $0x60] sm:$0xf] }
   0x8   :  { %v601_v28 = vld [vmem:[%s989_s3 + $0xf8] sm:$0xf0]  ;;  %89 = vmatpush.bf16.msra.mxu0 %v453_v11  ;;  %331 = vmatpush.bf16.msra.mxu3 %v536_v20  ;;  %v540_v29 = vor.u32 %v642_v23, %v537_v26  ;;  %v641_v32 = vld [vmem:[%s989_s3 + $0x64] sm:$0xf0]  ;;  %v591_v33 = vld [vmem:[%s989_s3 + $0xe0] sm:$0xf] }
   0x9   :  { %v604_v30 = vor.u32 %v658_v27, %v601_v28  ;;  %102 = vmatpush.bf16.msra.mxu1 %v457_v14  ;;  %v528_v34 = vor.u32 %v641_v32, %v527_v31  ;;  %v657_v35 = vld [vmem:[%s989_s3 + $0xe4] sm:$0xf0]  ;;  %v640_v36 = vld [vmem:[%s989_s3 + $0x64] sm:$0xf]  ;;  %v529_v37 = vld [vmem:[%s989_s3 + $0x68] sm:$0xf0] }
   0xa   :  { %v592_v38 = vor.u32 %v657_v35, %v591_v33  ;;  %v532_v39 = vor.u32 %v640_v36, %v529_v37  ;;  %v656_v40 = vld [vmem:[%s989_s3 + $0xe4] sm:$0xf]  ;;  %v593_v41 = vld [vmem:[%s989_s3 + $0xe8] sm:$0xf0]  ;;  %v519_v42 = vld [vmem:[%s989_s3 + $0x50] sm:$0xf] }
   0xb   :  { %474 = vmatmul.msk.bf16.vlgmr.msra.gmra.mxu0 %vm78_vm0, %v29_v19  ;;  %115 = vmatpush.bf16.msra.mxu2 %v461_v24  ;;  %v639_v43 = vld [vmem:[%s989_s3 + $0x54] sm:$0xf0]  ;;  %v583_v44 = vld [vmem:[%s989_s3 + $0xd0] sm:$0xf]  ;;  %v596_v46 = vor.u32 %v656_v40, %v593_v41  ;;  %v638_v47 = vld [vmem:[%s989_s3 + $0x54] sm:$0xf] }
   0xc   :  { %344 = vmatpush.bf16.msrb.mxu0 %v600_v25  ;;  %v655_v45 = vld [vmem:[%s989_s3 + $0xd4] sm:$0xf0]  ;;  %475 = vmatmul.msk.bf16.vlgmr.msra.gmra.mxu1 %vm78_vm0, %v29_v19  ;;  %v521_v48 = vld [vmem:[%s989_s3 + $0x58] sm:$0xf0]  ;;  %v520_v49 = vor.u32 %v639_v43, %v519_v42  ;;  %v654_v51 = vld [vmem:[%s989_s3 + $0xd4] sm:$0xf] }
   0xd   :  { %357 = vmatpush.bf16.msrb.mxu1 %v540_v29  ;;  %332 = vmatpush.bf16.msra.mxu3 %v528_v34  ;;  %v584_v50 = vor.u32 %v655_v45, %v583_v44  ;;  %v585_v52 = vld [vmem:[%s989_s3 + $0xd8] sm:$0xf0]  ;;  %v511_v53 = vld [vmem:[%s989_s3 + $0x40] sm:$0xf]  ;;  %v524_v54 = vor.u32 %v638_v47, %v521_v48  ;;  %v637_v55 = vld [vmem:[%s989_s3 + $0x44] sm:$0xf0] }
   0xe   :  { %476 = vmatmul.msk.bf16.vlgmr.msra.gmra.mxu2 %vm78_vm0, %v29_v19  ;;  %v575_v56 = vld [vmem:[%s989_s3 + $0xc0] sm:$0xf]  ;;  %v653_v57 = vld [vmem:[%s989_s3 + $0xc4] sm:$0xf0]  ;;  %v636_v58 = vld [vmem:[%s989_s3 + $0x44] sm:$0xf]  ;;  %v588_v60 = vor.u32 %v654_v51, %v585_v52  ;;  %v512_v61 = vor.u32 %v637_v55, %v511_v53 }
   0xf   :  { %370 = vmatpush.bf16.msrb.mxu2 %v604_v30  ;;  %v513_v59 = vld [vmem:[%s989_s3 + $0x48] sm:$0xf0]  ;;  %v576_v62 = vor.u32 %v653_v57, %v575_v56  ;;  %v652_v63 = vld [vmem:[%s989_s3 + $0xc4] sm:$0xf]  ;;  %v503_v3 = vld [vmem:[%s989_s3 + $0x30] sm:$0xf] }
  0x10   :  { %345 = vmatpush.bf16.msrb.mxu0 %v592_v38  ;;  %v577_v0 = vld [vmem:[%s989_s3 + $0xc8] sm:$0xf0]  ;;  %v516_v1 = vor.u32 %v636_v58, %v513_v59  ;;  %v635_v4 = vld [vmem:[%s989_s3 + $0x34] sm:$0xf0]  ;;  %v567_v5 = vld [vmem:[%s989_s3 + $0xb0] sm:$0xf] }
  0x11   :  { %358 = vmatpush.bf16.msrb.mxu1 %v532_v39  ;;  %333 = vmatpush.bf16.msra.mxu3 %v520_v49  ;;  %v580_v2 = vor.u32 %v652_v63, %v577_v0  ;;  %v504_v6 = vor.u32 %v635_v4, %v503_v3  ;;  %v651_v7 = vld [vmem:[%s989_s3 + $0xb4] sm:$0xf0]  ;;  %v634_v8 = vld [vmem:[%s989_s3 + $0x34] sm:$0xf]  ;;  %v505_v10 = vld [vmem:[%s989_s3 + $0x38] sm:$0xf0] }
  0x12   :  { %v568_v9 = vor.u32 %v651_v7, %v567_v5  ;;  %v650_v11 = vld [vmem:[%s989_s3 + $0xb4] sm:$0xf]  ;;  %v569_v12 = vld [vmem:[%s989_s3 + $0xb8] sm:$0xf0]  ;;  %v508_v13 = vor.u32 %v634_v8, %v505_v10  ;;  %v495_v15 = vld [vmem:[%s989_s3 + $0x20] sm:$0xf] }
  0x13   :  { %371 = vmatpush.bf16.msrb.mxu2 %v596_v46  ;;  %v572_v14 = vor.u32 %v650_v11, %v569_v12  ;;  %v633_v16 = vld [vmem:[%s989_s3 + $0x24] sm:$0xf0]  ;;  %v559_v17 = vld [vmem:[%s989_s3 + $0xa0] sm:$0xf]  ;;  %v632_v20 = vld [vmem:[%s989_s3 + $0x24] sm:$0xf] }
  0x14   :  { %346 = vmatpush.bf16.msrb.mxu0 %v584_v50  ;;  %v496_v18 = vor.u32 %v633_v16, %v495_v15  ;;  %v649_v19 = vld [vmem:[%s989_s3 + $0xa4] sm:$0xf0]  ;;  %v497_v21 = vld [vmem:[%s989_s3 + $0x28] sm:$0xf0]  ;;  %v648_v24 = vld [vmem:[%s989_s3 + $0xa4] sm:$0xf] }
  0x15   :  { %359 = vmatpush.bf16.msrb.mxu1 %v524_v54  ;;  %334 = vmatpush.bf16.msra.mxu3 %v512_v61  ;;  %v560_v22 = vor.u32 %v649_v19, %v559_v17  ;;  %v500_v23 = vor.u32 %v632_v20, %v497_v21  ;;  %v561_v25 = vld [vmem:[%s989_s3 + $0xa8] sm:$0xf0]  ;;  %v487_v27 = vld [vmem:[%s989_s3 + $0x10] sm:$0xf]  ;;  %v631_v28 = vld [vmem:[%s989_s3 + $0x14] sm:$0xf0] }
  0x16   :  { %v564_v26 = vor.u32 %v648_v24, %v561_v25  ;;  %v551_v29 = vld [vmem:[%s989_s3 + $0x90] sm:$0xf]  ;;  %v488_v30 = vor.u32 %v631_v28, %v487_v27  ;;  %v647_v31 = vld [vmem:[%s989_s3 + $0x94] sm:$0xf0]  ;;  %v630_v32 = vld [vmem:[%s989_s3 + $0x14] sm:$0xf] }
  0x17   :  { %372 = vmatpush.bf16.msrb.mxu2 %v588_v60  ;;  %v489_v33 = vld [vmem:[%s989_s3 + $0x18] sm:$0xf0]  ;;  %v552_v34 = vor.u32 %v647_v31, %v551_v29  ;;  %v646_v36 = vld [vmem:[%s989_s3 + $0x94] sm:$0xf]  ;;  %v479_v39 = vld [vmem:[%s989_s3] sm:$0xf] }
  0x18   :  { %347 = vmatpush.bf16.msrb.mxu0 %v576_v62  ;;  %v492_v35 = vor.u32 %v630_v32, %v489_v33  ;;  %v553_v37 = vld [vmem:[%s989_s3 + $0x98] sm:$0xf0]  ;;  %v629_v40 = vld [vmem:[%s989_s3 + $0x4] sm:$0xf0]  ;;  %v543_v41 = vld [vmem:[%s989_s3 + $0x80] sm:$0xf] }
  0x19   :  { %360 = vmatpush.bf16.msrb.mxu1 %v516_v1  ;;  %335 = vmatpush.bf16.msra.mxu3 %v504_v6  ;;  %v556_v38 = vor.u32 %v646_v36, %v553_v37  ;;  %v480_v42 = vor.u32 %v629_v40, %v479_v39  ;;  %v645_v43 = vld [vmem:[%s989_s3 + $0x84] sm:$0xf0]  ;;  %v628_v44 = vld [vmem:[%s989_s3 + $0x4] sm:$0xf]  ;;  %v481_v45 = vld [vmem:[%s989_s3 + $0x8] sm:$0xf0] }
  0x1a   :  { %v544_v46 = vor.u32 %v645_v43, %v543_v41  ;;  %v484_v47 = vor.u32 %v628_v44, %v481_v45  ;;  %v644_v48 = vld [vmem:[%s989_s3 + $0x84] sm:$0xf]  ;;  %v545_v49 = vld [vmem:[%s989_s3 + $0x88] sm:$0xf0]  ;;  %v663_v51 = vld [vmem:[%s991_s5 + $0x18] sm:$0xff] }
  0x1b   :  { %373 = vmatpush.bf16.msrb.mxu2 %v580_v2  ;;  %v548_v50 = vor.u32 %v644_v48, %v545_v49  ;;  %v662_v52 = vld [vmem:[%s991_s5 + $0x10] sm:$0xff]  ;;  %v661_v53 = vld [vmem:[%s991_s5 + $0x8] sm:$0xff]  ;;  %v38_v54 = vld [vmem:[%s992_s2] sm:$0x7] }
  0x1c   :  { %348 = vmatpush.bf16.msrb.mxu0 %v568_v9  ;;  %v660_v55 = vld [vmem:[%s991_s5] sm:$0xff]  ;;  %v40_v56 = vperm.slane %v38_v54, 0  ;;  %v41_v57 = vperm.slane %v38_v54, 1  ;;  %v42_v4 = vperm.slane %v38_v54, 2 }
  0x1d   :  { %361 = vmatpush.bf16.msrb.mxu1 %v508_v13  ;;  %336 = vmatpush.bf16.msra.mxu3 %v496_v18  ;;  %v158_v13 = vld [vmem:[%s994_s4] sm:$0x3] }
  0x1e   :  { %v161_v16 = vperm.slane %v158_v13, 1  ;;  %v160_v17 = vperm.slane %v158_v13, 0 }
  0x1f   :  { %374 = vmatpush.bf16.msrb.mxu2 %v572_v14 }
  0x20   :  { %349 = vmatpush.bf16.msrb.mxu0 %v560_v22 }
  0x21   :  { %362 = vmatpush.bf16.msrb.mxu1 %v500_v23  ;;  %337 = vmatpush.bf16.msra.mxu3 %v488_v30  ;;  %v664_v30 = vld [vmem:[%s993_s6] ss:$0 sm:$0xff] }
  0x23   :  { %375 = vmatpush.bf16.msrb.mxu2 %v564_v26 }
  0x24   :  { %350 = vmatpush.bf16.msrb.mxu0 %v552_v34 }
  0x25   :  { %363 = vmatpush.bf16.msrb.mxu1 %v492_v35  ;;  %338 = vmatpush.bf16.msra.mxu3 %v480_v42 }
  0x27   :  { %376 = vmatpush.bf16.msrb.mxu2 %v556_v38 }
  0x28   :  { %351 = vmatpush.bf16.msrb.mxu0 %v544_v46 }
  0x29   :  { %364 = vmatpush.bf16.msrb.mxu1 %v484_v47  ;;  %429 = vmatpush.bf16.msrb.mxu3 %v663_v51 }
  0x2b   :  { %377 = vmatpush.bf16.msrb.mxu2 %v548_v50 }
  0x2d   :  { %430 = vmatpush.bf16.msrb.mxu3 %v662_v52 }
  0x31   :  { %431 = vmatpush.bf16.msrb.mxu3 %v661_v53 }
  0x35   :  { %432 = vmatpush.bf16.msrb.mxu3 %v660_v55 }
  0x88   :  { %v91_v58 = vpop.f32.mrf.mxu0 }
  0x89   :  { %v92_v59 = vadd.f32 %v91_v58, %v40_v56  ;;  %v104_v60 = vpop.f32.mrf.mxu1 }
  0x8a   :  { %v105_v61 = vadd.f32 %v104_v60, %v41_v57 }
  0x8b   :  { %665 = vtanh.f32 %v92_v59 }
  0x8c   :  { %667 = vtanh.f32 %v105_v61 }
  0x90   :  { %v93_v62 = vpop.f32.mrf.mxu0 }
  0x91   :  { %v666_v63 = vpop.eup %665  ;;  %v106_v0 = vpop.f32.mrf.mxu1 }
  0x92   :  { %v117_v1 = vpop.f32.mrf.mxu2  ;;  %v668_v2 = vpop.eup %667 }
  0x93   :  { %v124_v3 = vpack.c.bf16 %v668_v2, %v666_v63  ;;  %v118_v9 = vadd.f32 %v117_v1, %v42_v4 }
  0x95   :  { %v165_v5 = vunpack.c.l.b16 %v124_v3  ;;  %v166_v6 = vunpack.c.h.b16 %v124_v3  ;;  %669 = vtanh.f32 %v118_v9 }
  0x97   :  { %v167_v7 = vpack.c.b16 %v165_v5, %v165_v5  ;;  %v168_v8 = vpack.c.b16 %v166_v6, %v166_v6 }
  0x99   :  { %339 = vmatmul.bf16.vlgmr.msra.gmra.mxu3 %v167_v7  ;;  %352 = vmatmul.bf16.vlgmr.msrb.gmra.mxu0 %v168_v8 }
  0x9a   :  { %v119_v10 = vpop.f32.mrf.mxu2  ;;  %365 = vmatmul.bf16.vlgmr.msrb.gmra.mxu1 %v167_v7  ;;  %378 = vmatmul.bf16.vlgmr.msrb.gmra.mxu2 %v168_v8 }
  0x9b   :  { %v670_v11 = vpop.eup %669 }
  0x9c   :  { %v125_v12 = vpack.c.bf16 %v670_v11, %v670_v11 }
  0xa9   :  { %621 = vmatmul.msk.bf16.vlgmr.msrb.gmra.mxu3 %vm421_vm1, %v125_v12 }
 0x116   :  { %v353_v14 = vpop.f32.mrf.mxu0 }
 0x117   :  { %v366_v15 = vpop.f32.mrf.mxu1 }
 0x118   :  { %v367_v18 = vadd.f32 %v366_v15, %v161_v16 }
 0x11c   :  { %v340_v19 = vpop.f32.mrf.mxu3 }
 0x11d   :  { %v341_v20 = vadd.f32 %v340_v19, %v160_v17  ;;  %v379_v21 = vpop.f32.mrf.mxu2 }
 0x11e   :  { %v380_v22 = vadd.f32 %v379_v21, %v367_v18  ;;  %v355_v23 = vpop.f32.mrf.mxu0 }
 0x11f   :  { %v354_v24 = vadd.f32 %v353_v14, %v341_v20  ;;  %v368_v25 = vpop.f32.mrf.mxu1 }
 0x120   :  { %671 = vtanh.f32 %v380_v22 }
 0x121   :  { %673 = vtanh.f32 %v354_v24 }
 0x124   :  { %v342_v26 = vpop.f32.mrf.mxu3 }
 0x125   :  { %v381_v27 = vpop.f32.mrf.mxu2 }
 0x126   :  { %v672_v28 = vpop.eup %671 }
 0x127   :  { %v674_v29 = vpop.eup %673  ;;  %441 = vst [vmem:[%s995_s8 + $0x8] sm:$0xff] %v672_v28 }
 0x128   :  { %440 = vst [vmem:[%s995_s8] sm:$0xff] %v674_v29 }
 0x12c   :  { %v434_v31 = vpop.f32.mrf.mxu3 }
 0x12d   :  { %v435_v32 = vadd.f32 %v664_v30, %v434_v31 }
 0x12f   :  { %675 = vtanh.f32 %v435_v32 }
 0x134   :  { %v436_v33 = vpop.f32.mrf.mxu3 }
 0x135   :  { %v676_v34 = vpop.eup %675 }
 0x136   :  { %439 = vst.msk [vmem:[%s996_s7] sm:$0xff] %vm421_vm1, %v676_v34 }

</bundles_post_ra>
